<compile_context>
chip_gen: v7x
topology: tpu7x:2x2x1
jax: 0.10.0
libtpu: 0.0.40
codegen_flags: <defaults>
</compile_context>

<pallas_src>
import functools

import jax
import jax.numpy as jnp
from jax import lax
from jax.experimental import pallas as pl
from jax.experimental.pallas import tpu as pltpu


def _round_up(x, m):
    return ((x + m - 1) // m) * m


def _attention_kernel(x_ref, wqkv_ref, wout_ref, o_ref, qkv_ref, stage_ref, *,
                      heads, dim_head, unroll_heads):
    # x_ref:     (block_b, n, dim)      activation tile (auto-pipelined)
    # wqkv_ref:  (dim, 3*inner)         fused QKV weight (scale folded into Q)
    # wout_ref:  (inner, dim)           output projection weight
    # o_ref:     (block_b, n, dim)
    # qkv_ref:   (m, 3*inner) scratch   fused QKV result (VMEM)
    # stage_ref: (m, inner)   scratch   per-head context staging (no concatenate)
    block_b, n, dim = x_ref.shape
    inner = heads * dim_head
    m = block_b * n
    cdt = qkv_ref.dtype                       # compute dtype for MXU operands

    x2d = x_ref[...].reshape(m, dim).astype(cdt)

    # ---- fused QKV projection: one full-width MXU matmul, f32 accumulation ----
    qkv_ref[...] = jnp.dot(x2d, wqkv_ref[...].astype(cdt),
                           preferred_element_type=jnp.float32).astype(cdt)

    # TODO(synk): for sequences beyond a few hundred tokens, add a KV-tile grid
    # axis with an online-softmax (m/l/acc) accumulator instead of materializing
    # the full (block_b, n, n) score tensor per head.
    def one_head(h):
        static = isinstance(h, int)

        def off(base):
            o = base + h * dim_head
            return o if static else pl.multiple_of(o, dim_head)

        q = qkv_ref[:, pl.ds(off(0), dim_head)].reshape(block_b, n, dim_head)
        k = qkv_ref[:, pl.ds(off(inner), dim_head)].reshape(block_b, n, dim_head)
        v = qkv_ref[:, pl.ds(off(2 * inner), dim_head)].reshape(block_b, n, dim_head)

        dots = jnp.einsum('bid,bjd->bij', q, k,
                          preferred_element_type=jnp.float32)      # (bb, n, n) f32
        mx = jnp.max(dots, axis=-1, keepdims=True)
        e = jnp.exp(dots - mx)
        denom = jnp.sum(e, axis=-1, keepdims=True)
        # approx reciprocal runs on the EUP slot (~1e-3 rel err on attn rows);
        # switch to approx=False if this ever feeds training at tight tolerance.
        attn = (e * pl.reciprocal(denom, approx=True)).astype(cdt)

        ctx = jnp.einsum('bij,bjd->bid', attn, v,
                         preferred_element_type=jnp.float32)       # (bb, n, dh) f32
        stage_ref[:, pl.ds(off(0), dim_head)] = ctx.reshape(m, dim_head).astype(cdt)

    if unroll_heads:
        for h in range(heads):                 # fallback: static lane offsets only
            one_head(h)
    else:
        def body(h, carry):                    # bounded live ranges per head
            one_head(h)
            return carry
        lax.fori_loop(0, heads, body, 0)

    # ---- fused output projection: (m, inner) x (inner, dim), K = inner ----
    y = jnp.dot(stage_ref[...], wout_ref[...].astype(cdt),
                preferred_element_type=jnp.float32)
    o_ref[...] = y.reshape(block_b, n, dim).astype(o_ref.dtype)


def _vmem_capacity_bytes():
    try:
        info = pltpu.get_tpu_info()
        cap = getattr(info, "vmem_capacity_bytes", None)
        if cap:
            return int(cap)
    except Exception:
        pass
    return 64 * 1024 * 1024          # conservative fallback (v7x: 64 MiB per TC)


def _vmem_estimate_bytes(block_b, n, dim, inner, dim_head, in_isz, c_isz, w_bufs):
    m = block_b * n
    io = 2 * 2 * block_b * n * dim * in_isz                        # x + out, 2x-buffered
    w = w_bufs * (dim * 3 * inner + inner * dim) * in_isz
    scr = (m * 3 * inner + m * inner) * c_isz                      # qkv + stage scratch
    head = (2 * block_b * n * n * 4 + block_b * n * n * c_isz      # dots/e (f32) + attn
            + 3 * m * dim_head * c_isz + block_b * n * dim_head * 4)
    proj = m * (3 * inner + dim) * 4                               # f32 matmul results
    return io + w + scr + head + proj


def _pick_block_b(b, n, dim, inner, dim_head, in_isz, c_isz, budget):
    # Fill the MXU M dimension (~512 rows per grid step), capped by batch and
    # by the VMEM budget.  No ">=2 grid steps" forcing.
    bb = max(1, min(b, max(1, 512 // max(n, 1))))
    while bb > 1 and _vmem_estimate_bytes(bb, n, dim, inner, dim_head,
                                          in_isz, c_isz, 1) > budget:
        bb = max(1, bb // 2)
    return bb


def attention_pallas(x, w_qkv, w_out=None, *, heads, dim_head,
                     block_b=None, matmul_dtype=None):
    """x: (b, n, dim); w_qkv: (dim, 3*heads*dim_head); w_out: (heads*dim_head, dim).

    matmul_dtype=jnp.bfloat16 selects the bf16 MXU fast path (f32 accumulation),
    recommended for f32 inputs on v5e.  w_out=None corresponds to the module's
    Identity projection (heads == 1 and dim_head == dim).
    """
    b, n, dim = x.shape
    inner = heads * dim_head
    assert w_qkv.shape == (dim, 3 * inner)
    if w_out is None:                    # nn.Identity() branch of the module
        assert inner == dim
        w_out = jnp.eye(inner, dtype=x.dtype)
    assert w_out.shape == (inner, dim)

    # Fold the softmax scale into the Q columns of the QKV weight (host, free).
    scale = dim_head ** (-0.5)
    w_qkv = w_qkv.at[:, :inner].multiply(jnp.asarray(scale, dtype=w_qkv.dtype))

    cdt = jnp.dtype(matmul_dtype) if matmul_dtype is not None else x.dtype
    in_isz = x.dtype.itemsize
    c_isz = cdt.itemsize

    cap = _vmem_capacity_bytes()
    if block_b is None:
        block_b = _pick_block_b(b, n, dim, inner, dim_head, in_isz, c_isz,
                                int(cap * 0.75))

    # Only the batch axis is ever padded (remainder tiles); padded rows are
    # zeros -> uniform softmax -> finite, and they are sliced off afterwards.
    b_pad = _round_up(b, block_b)
    x_p = x if b_pad == b else jnp.pad(x, ((0, b_pad - b), (0, 0), (0, 0)))

    m = block_b * n
    grid = (b_pad // block_b,)
    est = _vmem_estimate_bytes(block_b, n, dim, inner, dim_head, in_isz, c_isz, 1)
    vmem_limit = int(min(max(2 * est, 32 << 20), int(cap * 0.9)))

    def build(single_buffer_weights, unroll_heads):
        w_kwargs = (dict(pipeline_mode=pl.Buffered(1))
                    if single_buffer_weights else {})
        kernel = functools.partial(_attention_kernel, heads=heads,
                                   dim_head=dim_head, unroll_heads=unroll_heads)
        return pl.pallas_call(
            kernel,
            out_shape=jax.ShapeDtypeStruct((b_pad, n, dim), x.dtype),
            grid_spec=pltpu.PrefetchScalarGridSpec(
                num_scalar_prefetch=0,
                grid=grid,
                in_specs=[
                    pl.BlockSpec((block_b, n, dim), lambda i: (i, 0, 0)),
                    pl.BlockSpec((dim, 3 * inner), lambda i: (0, 0), **w_kwargs),
                    pl.BlockSpec((inner, dim), lambda i: (0, 0), **w_kwargs),
                ],
                out_specs=pl.BlockSpec((block_b, n, dim), lambda i: (i, 0, 0)),
                scratch_shapes=[pltpu.VMEM((m, 3 * inner), cdt),
                                pltpu.VMEM((m, inner), cdt)],
            ),
            compiler_params=pltpu.CompilerParams(
                dimension_semantics=("parallel",),
                vmem_limit_bytes=vmem_limit),
        )

    # Preferred config: fori_loop head loop (bounded live ranges) + single-
    # buffered weights.  Fall back to statically-unrolled heads with default
    # weight buffering if the preferred config fails to lower on this
    # jax/Mosaic version (dynamic lane-offset slicing / Buffered(1)).
    try:
        out_p = jax.block_until_ready(build(True, False)(x_p, w_qkv, w_out))
    except Exception:
        out_p = build(False, True)(x_p, w_qkv, w_out)

    return out_p[:b] if b_pad != b else out_p


def attention_reference(x, w_qkv, w_out, *, heads, dim_head):
    """Pure-JAX reference matching the PyTorch forward semantics."""
    b, n, dim = x.shape
    scale = dim_head ** (-0.5)
    qkv = jnp.einsum('bnd,de->bne', x, w_qkv)
    q, k, v = jnp.split(qkv, 3, axis=-1)

    def to_heads(t):
        return t.reshape(b, n, heads, dim_head).transpose(0, 2, 1, 3)

    q, k, v = to_heads(q), to_heads(k), to_heads(v)
    dots = jnp.einsum('bhid,bhjd->bhij', q, k) * scale
    attn = jax.nn.softmax(dots, axis=-1)
    out = jnp.einsum('bhij,bhjd->bhid', attn, v)
    out = out.transpose(0, 2, 1, 3).reshape(b, n, heads * dim_head)
    return jnp.einsum('bne,ed->bnd', out, w_out)


if __name__ == "__main__":
    # Small shapes consistent with the module: dim=32, heads=4, dim_head=8.
    B, N, DIM = 2, 8, 32
    HEADS, DIM_HEAD = 4, 8
    INNER = HEADS * DIM_HEAD       # 32 -> project_out is True (heads != 1)

    key = jax.random.PRNGKey(0)
    kx, kqkv, kout = jax.random.split(key, 3)

    x = jax.random.normal(kx, (B, N, DIM), dtype=jnp.float32)

    # Deterministic parameter init (nn.Linear-style uniform, no bias).
    # Stored pre-transposed so the kernel computes x @ W directly.
    bound_qkv = 1.0 / (DIM ** 0.5)
    w_qkv = jax.random.uniform(kqkv, (DIM, 3 * INNER), dtype=jnp.float32,
                               minval=-bound_qkv, maxval=bound_qkv)
    bound_out = 1.0 / (INNER ** 0.5)
    w_out = jax.random.uniform(kout, (INNER, DIM), dtype=jnp.float32,
                               minval=-bound_out, maxval=bound_out)

    y = attention_pallas(x, w_qkv, w_out, heads=HEADS, dim_head=DIM_HEAD)
    y = jax.block_until_ready(y)

    y_ref = attention_reference(x, w_qkv, w_out, heads=HEADS, dim_head=DIM_HEAD)
    # Tolerance accounts for the EUP approximate reciprocal in the softmax.
    if not jnp.allclose(y, y_ref, atol=1e-2, rtol=1e-2):
        raise AssertionError("Pallas attention does not match reference")

    print("KERNEL_OK")
</pallas_src>

<mosaic_0001>
module attributes {stable_mosaic.version = 11 : i64} {
  func.func @_attention_kernel(%arg0: i32, %arg1: memref<2x8x32xf32, #tpu.memory_space<vmem>>, %arg2: memref<32x96xf32, #tpu.memory_space<vmem>>, %arg3: memref<32x32xf32, #tpu.memory_space<vmem>>, %arg4: memref<2x8x32xf32, #tpu.memory_space<vmem>>, %arg5: memref<16x96xf32, #tpu.memory_space<vmem>>, %arg6: memref<16x32xf32, #tpu.memory_space<vmem>>) attributes {dimension_semantics = [#tpu.dimension_semantics<parallel>], iteration_bounds = array<i64: 1>, scalar_prefetch = 0 : i64, scratch_operands = 2 : i64, tpu.core_type = #tpu.core_type<tc>, window_params = [{transform_indices = @transform_0, window_bounds = array<i64: 2, 8, 32>}, {pipeline_mode = #tpu.pipeline_mode<synchronous>, transform_indices = @transform_1, window_bounds = array<i64: 32, 96>}, {pipeline_mode = #tpu.pipeline_mode<synchronous>, transform_indices = @transform_2, window_bounds = array<i64: 32, 32>}, {transform_indices = @transform_3, window_bounds = array<i64: 2, 8, 32>}]} {
    %c0 = arith.constant 0 : index
    %c0_0 = arith.constant 0 : index
    %c0_1 = arith.constant 0 : index
    %0 = vector.load %arg1[%c0, %c0_0, %c0_1] : memref<2x8x32xf32, #tpu.memory_space<vmem>>, vector<2x8x32xf32>
    %1 = vector.shape_cast %0 : vector<2x8x32xf32> to vector<16x32xf32>
    %c0_2 = arith.constant 0 : index
    %c0_3 = arith.constant 0 : index
    %2 = vector.load %arg2[%c0_2, %c0_3] : memref<32x96xf32, #tpu.memory_space<vmem>>, vector<32x96xf32>
    %cst = arith.constant dense<0.000000e+00> : vector<16x96xf32>
    %3 = tpu.matmul %1, %2, %cst {dimension_numbers = #tpu.dot_dimension_numbers<[1], [0], [0], [1], [0, 0, 1, 1], [], []>} : vector<16x32xf32>, vector<32x96xf32>, vector<16x96xf32> -> vector<16x96xf32>
    %c0_4 = arith.constant 0 : index
    %c0_5 = arith.constant 0 : index
    %4 = vector.load %arg5[%c0_4, %c0_5] : memref<16x96xf32, #tpu.memory_space<vmem>>, vector<16x96xf32>
    tpu.vector_store %arg5[%c0_4, %c0_5], %3 {strides = array<i32>} : memref<16x96xf32, #tpu.memory_space<vmem>>, vector<16x96xf32>,
    %c0_i32 = arith.constant 0 : i32
    %c4_i32 = arith.constant 4 : i32
    %5 = arith.addi %c0_i32, %c4_i32 : i32
    %c1_i32 = arith.constant 1 : i32
    scf.for %arg7 = %c0_i32 to %5 step %c1_i32  : i32 {
      %c8_i32 = arith.constant 8 : i32
      %11 = arith.muli %arg7, %c8_i32 : i32
      %c0_i32_15 = arith.constant 0 : i32
      %12 = arith.addi %c0_i32_15, %11 : i32
      %13 = tpu.assume_multiple %12, 8 : i32
      %c0_16 = arith.constant 0 : index
      %14 = arith.index_cast %13 : i32 to index
      %15 = vector.load %arg5[%c0_16, %14] : memref<16x96xf32, #tpu.memory_space<vmem>>, vector<16x8xf32>
      %16 = vector.shape_cast %15 : vector<16x8xf32> to vector<2x8x8xf32>
      %c8_i32_17 = arith.constant 8 : i32
      %17 = arith.muli %arg7, %c8_i32_17 : i32
      %c32_i32 = arith.constant 32 : i32
      %18 = arith.addi %c32_i32, %17 : i32
      %19 = tpu.assume_multiple %18, 8 : i32
      %c0_18 = arith.constant 0 : index
      %20 = arith.index_cast %19 : i32 to index
      %21 = vector.load %arg5[%c0_18, %20] : memref<16x96xf32, #tpu.memory_space<vmem>>, vector<16x8xf32>
      %22 = vector.shape_cast %21 : vector<16x8xf32> to vector<2x8x8xf32>
      %c8_i32_19 = arith.constant 8 : i32
      %23 = arith.muli %arg7, %c8_i32_19 : i32
      %c64_i32 = arith.constant 64 : i32
      %24 = arith.addi %c64_i32, %23 : i32
      %25 = tpu.assume_multiple %24, 8 : i32
      %c0_20 = arith.constant 0 : index
      %26 = arith.index_cast %25 : i32 to index
      %27 = vector.load %arg5[%c0_20, %26] : memref<16x96xf32, #tpu.memory_space<vmem>>, vector<16x8xf32>
      %28 = vector.shape_cast %27 : vector<16x8xf32> to vector<2x8x8xf32>
      "tpu.trace_start"() <{level = 10 : i32, message = "bid,bjd->bij"}> : () -> ()
      %cst_21 = arith.constant dense<0.000000e+00> : vector<2x8x8xf32>
      %29 = tpu.matmul %16, %22, %cst_21 {dimension_numbers = #tpu.dot_dimension_numbers<[2], [2], [1], [1], [0, 0, 0, 1, 1, 1], [0], [0]>} : vector<2x8x8xf32>, vector<2x8x8xf32>, vector<2x8x8xf32> -> vector<2x8x8xf32>
      "tpu.trace_stop"() : () -> ()
      %cst_22 = arith.constant dense<0xFF800000> : vector<2x8xf32>
      %30 = vector.multi_reduction <maximumf>, %29, %cst_22 [2] : vector<2x8x8xf32> to vector<2x8xf32>
      %31 = vector.shape_cast %30 : vector<2x8xf32> to vector<2x8x1xf32>
      %32 = vector.broadcast %31 : vector<2x8x1xf32> to vector<2x8x8xf32>
      %33 = arith.subf %29, %32 : vector<2x8x8xf32>
      %34 = math.exp %33 : vector<2x8x8xf32>
      %cst_23 = arith.constant dense<0.000000e+00> : vector<2x8xf32>
      %35 = vector.multi_reduction <add>, %34, %cst_23 [2] : vector<2x8x8xf32> to vector<2x8xf32>
      %36 = vector.shape_cast %35 : vector<2x8xf32> to vector<2x8x1xf32>
      %37 = tpu.reciprocal %36 {approx = true} : vector<2x8x1xf32> -> vector<2x8x1xf32>
      %38 = vector.broadcast %37 : vector<2x8x1xf32> to vector<2x8x8xf32>
      %39 = arith.mulf %34, %38 : vector<2x8x8xf32>
      "tpu.trace_start"() <{level = 10 : i32, message = "bij,bjd->bid"}> : () -> ()
      %cst_24 = arith.constant dense<0.000000e+00> : vector<2x8x8xf32>
      %40 = tpu.matmul %39, %28, %cst_24 {dimension_numbers = #tpu.dot_dimension_numbers<[2], [1], [1], [2], [0, 0, 0, 1, 1, 2], [0], [0]>} : vector<2x8x8xf32>, vector<2x8x8xf32>, vector<2x8x8xf32> -> vector<2x8x8xf32>
      "tpu.trace_stop"() : () -> ()
      %41 = vector.shape_cast %40 : vector<2x8x8xf32> to vector<16x8xf32>
      %c8_i32_25 = arith.constant 8 : i32
      %42 = arith.muli %arg7, %c8_i32_25 : i32
      %c0_i32_26 = arith.constant 0 : i32
      %43 = arith.addi %c0_i32_26, %42 : i32
      %44 = tpu.assume_multiple %43, 8 : i32
      %c0_27 = arith.constant 0 : index
      %45 = arith.index_cast %44 : i32 to index
      %46 = vector.load %arg6[%c0_27, %45] : memref<16x32xf32, #tpu.memory_space<vmem>>, vector<16x8xf32>
      tpu.vector_store %arg6[%c0_27, %45], %41 {strides = array<i32>} : memref<16x32xf32, #tpu.memory_space<vmem>>, vector<16x8xf32>,
    }
    %c4_i32_6 = arith.constant 4 : i32
    %c0_7 = arith.constant 0 : index
    %c0_8 = arith.constant 0 : index
    %6 = vector.load %arg6[%c0_7, %c0_8] : memref<16x32xf32, #tpu.memory_space<vmem>>, vector<16x32xf32>
    %c0_9 = arith.constant 0 : index
    %c0_10 = arith.constant 0 : index
    %7 = vector.load %arg3[%c0_9, %c0_10] : memref<32x32xf32, #tpu.memory_space<vmem>>, vector<32x32xf32>
    %cst_11 = arith.constant dense<0.000000e+00> : vector<16x32xf32>
    %8 = tpu.matmul %6, %7, %cst_11 {dimension_numbers = #tpu.dot_dimension_numbers<[1], [0], [0], [1], [0, 0, 1, 1], [], []>} : vector<16x32xf32>, vector<32x32xf32>, vector<16x32xf32> -> vector<16x32xf32>
    %9 = vector.shape_cast %8 : vector<16x32xf32> to vector<2x8x32xf32>
    %c0_12 = arith.constant 0 : index
    %c0_13 = arith.constant 0 : index
    %c0_14 = arith.constant 0 : index
    %10 = vector.load %arg4[%c0_12, %c0_13, %c0_14] : memref<2x8x32xf32, #tpu.memory_space<vmem>>, vector<2x8x32xf32>
    tpu.vector_store %arg4[%c0_12, %c0_13, %c0_14], %9 {strides = array<i32>} : memref<2x8x32xf32, #tpu.memory_space<vmem>>, vector<2x8x32xf32>,
    return
  }
  func.func @transform_0(%arg0: i32) -> (i32, i32, i32) {
    %c0_i32 = arith.constant 0 : i32
    %c0_i32_0 = arith.constant 0 : i32
    %c0_i32_1 = arith.constant 0 : i32
    return %arg0, %c0_i32, %c0_i32_0 : i32, i32, i32
  }
  func.func @transform_1(%arg0: i32) -> (i32, i32) {
    %c0_i32 = arith.constant 0 : i32
    %c0_i32_0 = arith.constant 0 : i32
    %c0_i32_1 = arith.constant 0 : i32
    return %c0_i32, %c0_i32_0 : i32, i32
  }
  func.func @transform_2(%arg0: i32) -> (i32, i32) {
    %c0_i32 = arith.constant 0 : i32
    %c0_i32_0 = arith.constant 0 : i32
    %c0_i32_1 = arith.constant 0 : i32
    return %c0_i32, %c0_i32_0 : i32, i32
  }
  func.func @transform_3(%arg0: i32) -> (i32, i32, i32) {
    %c0_i32 = arith.constant 0 : i32
    %c0_i32_0 = arith.constant 0 : i32
    %c0_i32_1 = arith.constant 0 : i32
    return %arg0, %c0_i32, %c0_i32_0 : i32, i32, i32
  }
}

module attributes {stable_mosaic.version = 11 : i64} {
  func.func @_attention_kernel(%arg0: i32, %arg1: memref<2x8x32xf32, #tpu.memory_space<vmem>>, %arg2: memref<32x96xf32, #tpu.memory_space<vmem>>, %arg3: memref<32x32xf32, #tpu.memory_space<vmem>>, %arg4: memref<2x8x32xf32, #tpu.memory_space<vmem>>, %arg5: memref<16x96xf32, #tpu.memory_space<vmem>>, %arg6: memref<16x32xf32, #tpu.memory_space<vmem>>) attributes {dimension_semantics = [#tpu.dimension_semantics<parallel>], iteration_bounds = array<i64: 1>, scalar_prefetch = 0 : i64, scratch_operands = 2 : i64, tpu.core_type = #tpu.core_type<tc>, window_params = [{transform_indices = @transform_0, window_bounds = array<i64: 2, 8, 32>}, {pipeline_mode = #tpu.pipeline_mode<synchronous>, transform_indices = @transform_1, window_bounds = array<i64: 32, 96>}, {pipeline_mode = #tpu.pipeline_mode<synchronous>, transform_indices = @transform_2, window_bounds = array<i64: 32, 32>}, {transform_indices = @transform_3, window_bounds = array<i64: 2, 8, 32>}]} {
    %c0 = arith.constant 0 : index
    %c0_0 = arith.constant 0 : index
    %c0_1 = arith.constant 0 : index
    %0 = vector.load %arg1[%c0, %c0_0, %c0_1] : memref<2x8x32xf32, #tpu.memory_space<vmem>>, vector<2x8x32xf32>
    %1 = vector.shape_cast %0 : vector<2x8x32xf32> to vector<16x32xf32>
    %c0_2 = arith.constant 0 : index
    %c0_3 = arith.constant 0 : index
    %2 = vector.load %arg2[%c0_2, %c0_3] : memref<32x96xf32, #tpu.memory_space<vmem>>, vector<32x96xf32>
    %cst = arith.constant dense<0.000000e+00> : vector<16x96xf32>
    %3 = tpu.matmul %1, %2, %cst {dimension_numbers = #tpu.dot_dimension_numbers<[1], [0], [0], [1], [0, 0, 1, 1], [], []>} : vector<16x32xf32>, vector<32x96xf32>, vector<16x96xf32> -> vector<16x96xf32>
    %c0_4 = arith.constant 0 : index
    %c0_5 = arith.constant 0 : index
    %4 = vector.load %arg5[%c0_4, %c0_5] : memref<16x96xf32, #tpu.memory_space<vmem>>, vector<16x96xf32>
    tpu.vector_store %arg5[%c0_4, %c0_5], %3 {strides = array<i32>} : memref<16x96xf32, #tpu.memory_space<vmem>>, vector<16x96xf32>,
    %c0_6 = arith.constant 0 : index
    %c0_7 = arith.constant 0 : index
    %5 = vector.load %arg5[%c0_6, %c0_7] : memref<16x96xf32, #tpu.memory_space<vmem>>, vector<16x8xf32>
    %6 = vector.shape_cast %5 : vector<16x8xf32> to vector<2x8x8xf32>
    %c0_8 = arith.constant 0 : index
    %c32 = arith.constant 32 : index
    %7 = vector.load %arg5[%c0_8, %c32] : memref<16x96xf32, #tpu.memory_space<vmem>>, vector<16x8xf32>
    %8 = vector.shape_cast %7 : vector<16x8xf32> to vector<2x8x8xf32>
    %c0_9 = arith.constant 0 : index
    %c64 = arith.constant 64 : index
    %9 = vector.load %arg5[%c0_9, %c64] : memref<16x96xf32, #tpu.memory_space<vmem>>, vector<16x8xf32>
    %10 = vector.shape_cast %9 : vector<16x8xf32> to vector<2x8x8xf32>
    "tpu.trace_start"() <{level = 10 : i32, message = "bid,bjd->bij"}> : () -> ()
    %cst_10 = arith.constant dense<0.000000e+00> : vector<2x8x8xf32>
    %11 = tpu.matmul %6, %8, %cst_10 {dimension_numbers = #tpu.dot_dimension_numbers<[2], [2], [1], [1], [0, 0, 0, 1, 1, 1], [0], [0]>} : vector<2x8x8xf32>, vector<2x8x8xf32>, vector<2x8x8xf32> -> vector<2x8x8xf32>
    "tpu.trace_stop"() : () -> ()
    %cst_11 = arith.constant dense<0xFF800000> : vector<2x8xf32>
    %12 = vector.multi_reduction <maximumf>, %11, %cst_11 [2] : vector<2x8x8xf32> to vector<2x8xf32>
    %13 = vector.shape_cast %12 : vector<2x8xf32> to vector<2x8x1xf32>
    %14 = vector.broadcast %13 : vector<2x8x1xf32> to vector<2x8x8xf32>
    %15 = arith.subf %11, %14 : vector<2x8x8xf32>
    %16 = math.exp %15 : vector<2x8x8xf32>
    %cst_12 = arith.constant dense<0.000000e+00> : vector<2x8xf32>
    %17 = vector.multi_reduction <add>, %16, %cst_12 [2] : vector<2x8x8xf32> to vector<2x8xf32>
    %18 = vector.shape_cast %17 : vector<2x8xf32> to vector<2x8x1xf32>
    %19 = tpu.reciprocal %18 {approx = true} : vector<2x8x1xf32> -> vector<2x8x1xf32>
    %20 = vector.broadcast %19 : vector<2x8x1xf32> to vector<2x8x8xf32>
    %21 = arith.mulf %16, %20 : vector<2x8x8xf32>
    "tpu.trace_start"() <{level = 10 : i32, message = "bij,bjd->bid"}> : () -> ()
    %cst_13 = arith.constant dense<0.000000e+00> : vector<2x8x8xf32>
    %22 = tpu.matmul %21, %10, %cst_13 {dimension_numbers = #tpu.dot_dimension_numbers<[2], [1], [1], [2], [0, 0, 0, 1, 1, 2], [0], [0]>} : vector<2x8x8xf32>, vector<2x8x8xf32>, vector<2x8x8xf32> -> vector<2x8x8xf32>
    "tpu.trace_stop"() : () -> ()
    %23 = vector.shape_cast %22 : vector<2x8x8xf32> to vector<16x8xf32>
    %c0_14 = arith.constant 0 : index
    %c0_15 = arith.constant 0 : index
    %24 = vector.load %arg6[%c0_14, %c0_15] : memref<16x32xf32, #tpu.memory_space<vmem>>, vector<16x8xf32>
    tpu.vector_store %arg6[%c0_14, %c0_15], %23 {strides = array<i32>} : memref<16x32xf32, #tpu.memory_space<vmem>>, vector<16x8xf32>,
    %c0_16 = arith.constant 0 : index
    %c8 = arith.constant 8 : index
    %25 = vector.load %arg5[%c0_16, %c8] : memref<16x96xf32, #tpu.memory_space<vmem>>, vector<16x8xf32>
    %26 = vector.shape_cast %25 : vector<16x8xf32> to vector<2x8x8xf32>
    %c0_17 = arith.constant 0 : index
    %c40 = arith.constant 40 : index
    %27 = vector.load %arg5[%c0_17, %c40] : memref<16x96xf32, #tpu.memory_space<vmem>>, vector<16x8xf32>
    %28 = vector.shape_cast %27 : vector<16x8xf32> to vector<2x8x8xf32>
    %c0_18 = arith.constant 0 : index
    %c72 = arith.constant 72 : index
    %29 = vector.load %arg5[%c0_18, %c72] : memref<16x96xf32, #tpu.memory_space<vmem>>, vector<16x8xf32>
    %30 = vector.shape_cast %29 : vector<16x8xf32> to vector<2x8x8xf32>
    "tpu.trace_start"() <{level = 10 : i32, message = "bid,bjd->bij"}> : () -> ()
    %cst_19 = arith.constant dense<0.000000e+00> : vector<2x8x8xf32>
    %31 = tpu.matmul %26, %28, %cst_19 {dimension_numbers = #tpu.dot_dimension_numbers<[2], [2], [1], [1], [0, 0, 0, 1, 1, 1], [0], [0]>} : vector<2x8x8xf32>, vector<2x8x8xf32>, vector<2x8x8xf32> -> vector<2x8x8xf32>
    "tpu.trace_stop"() : () -> ()
    %cst_20 = arith.constant dense<0xFF800000> : vector<2x8xf32>
    %32 = vector.multi_reduction <maximumf>, %31, %cst_20 [2] : vector<2x8x8xf32> to vector<2x8xf32>
    %33 = vector.shape_cast %32 : vector<2x8xf32> to vector<2x8x1xf32>
    %34 = vector.broadcast %33 : vector<2x8x1xf32> to vector<2x8x8xf32>
    %35 = arith.subf %31, %34 : vector<2x8x8xf32>
    %36 = math.exp %35 : vector<2x8x8xf32>
    %cst_21 = arith.constant dense<0.000000e+00> : vector<2x8xf32>
    %37 = vector.multi_reduction <add>, %36, %cst_21 [2] : vector<2x8x8xf32> to vector<2x8xf32>
    %38 = vector.shape_cast %37 : vector<2x8xf32> to vector<2x8x1xf32>
    %39 = tpu.reciprocal %38 {approx = true} : vector<2x8x1xf32> -> vector<2x8x1xf32>
    %40 = vector.broadcast %39 : vector<2x8x1xf32> to vector<2x8x8xf32>
    %41 = arith.mulf %36, %40 : vector<2x8x8xf32>
    "tpu.trace_start"() <{level = 10 : i32, message = "bij,bjd->bid"}> : () -> ()
    %cst_22 = arith.constant dense<0.000000e+00> : vector<2x8x8xf32>
    %42 = tpu.matmul %41, %30, %cst_22 {dimension_numbers = #tpu.dot_dimension_numbers<[2], [1], [1], [2], [0, 0, 0, 1, 1, 2], [0], [0]>} : vector<2x8x8xf32>, vector<2x8x8xf32>, vector<2x8x8xf32> -> vector<2x8x8xf32>
    "tpu.trace_stop"() : () -> ()
    %43 = vector.shape_cast %42 : vector<2x8x8xf32> to vector<16x8xf32>
    %c0_23 = arith.constant 0 : index
    %c8_24 = arith.constant 8 : index
    %44 = vector.load %arg6[%c0_23, %c8_24] : memref<16x32xf32, #tpu.memory_space<vmem>>, vector<16x8xf32>
    tpu.vector_store %arg6[%c0_23, %c8_24], %43 {strides = array<i32>} : memref<16x32xf32, #tpu.memory_space<vmem>>, vector<16x8xf32>,
    %c0_25 = arith.constant 0 : index
    %c16 = arith.constant 16 : index
    %45 = vector.load %arg5[%c0_25, %c16] : memref<16x96xf32, #tpu.memory_space<vmem>>, vector<16x8xf32>
    %46 = vector.shape_cast %45 : vector<16x8xf32> to vector<2x8x8xf32>
    %c0_26 = arith.constant 0 : index
    %c48 = arith.constant 48 : index
    %47 = vector.load %arg5[%c0_26, %c48] : memref<16x96xf32, #tpu.memory_space<vmem>>, vector<16x8xf32>
    %48 = vector.shape_cast %47 : vector<16x8xf32> to vector<2x8x8xf32>
    %c0_27 = arith.constant 0 : index
    %c80 = arith.constant 80 : index
    %49 = vector.load %arg5[%c0_27, %c80] : memref<16x96xf32, #tpu.memory_space<vmem>>, vector<16x8xf32>
    %50 = vector.shape_cast %49 : vector<16x8xf32> to vector<2x8x8xf32>
    "tpu.trace_start"() <{level = 10 : i32, message = "bid,bjd->bij"}> : () -> ()
    %cst_28 = arith.constant dense<0.000000e+00> : vector<2x8x8xf32>
    %51 = tpu.matmul %46, %48, %cst_28 {dimension_numbers = #tpu.dot_dimension_numbers<[2], [2], [1], [1], [0, 0, 0, 1, 1, 1], [0], [0]>} : vector<2x8x8xf32>, vector<2x8x8xf32>, vector<2x8x8xf32> -> vector<2x8x8xf32>
    "tpu.trace_stop"() : () -> ()
    %cst_29 = arith.constant dense<0xFF800000> : vector<2x8xf32>
    %52 = vector.multi_reduction <maximumf>, %51, %cst_29 [2] : vector<2x8x8xf32> to vector<2x8xf32>
    %53 = vector.shape_cast %52 : vector<2x8xf32> to vector<2x8x1xf32>
    %54 = vector.broadcast %53 : vector<2x8x1xf32> to vector<2x8x8xf32>
    %55 = arith.subf %51, %54 : vector<2x8x8xf32>
    %56 = math.exp %55 : vector<2x8x8xf32>
    %cst_30 = arith.constant dense<0.000000e+00> : vector<2x8xf32>
    %57 = vector.multi_reduction <add>, %56, %cst_30 [2] : vector<2x8x8xf32> to vector<2x8xf32>
    %58 = vector.shape_cast %57 : vector<2x8xf32> to vector<2x8x1xf32>
    %59 = tpu.reciprocal %58 {approx = true} : vector<2x8x1xf32> -> vector<2x8x1xf32>
    %60 = vector.broadcast %59 : vector<2x8x1xf32> to vector<2x8x8xf32>
    %61 = arith.mulf %56, %60 : vector<2x8x8xf32>
    "tpu.trace_start"() <{level = 10 : i32, message = "bij,bjd->bid"}> : () -> ()
    %cst_31 = arith.constant dense<0.000000e+00> : vector<2x8x8xf32>
    %62 = tpu.matmul %61, %50, %cst_31 {dimension_numbers = #tpu.dot_dimension_numbers<[2], [1], [1], [2], [0, 0, 0, 1, 1, 2], [0], [0]>} : vector<2x8x8xf32>, vector<2x8x8xf32>, vector<2x8x8xf32> -> vector<2x8x8xf32>
    "tpu.trace_stop"() : () -> ()
    %63 = vector.shape_cast %62 : vector<2x8x8xf32> to vector<16x8xf32>
    %c0_32 = arith.constant 0 : index
    %c16_33 = arith.constant 16 : index
    %64 = vector.load %arg6[%c0_32, %c16_33] : memref<16x32xf32, #tpu.memory_space<vmem>>, vector<16x8xf32>
    tpu.vector_store %arg6[%c0_32, %c16_33], %63 {strides = array<i32>} : memref<16x32xf32, #tpu.memory_space<vmem>>, vector<16x8xf32>,
    %c0_34 = arith.constant 0 : index
    %c24 = arith.constant 24 : index
    %65 = vector.load %arg5[%c0_34, %c24] : memref<16x96xf32, #tpu.memory_space<vmem>>, vector<16x8xf32>
    %66 = vector.shape_cast %65 : vector<16x8xf32> to vector<2x8x8xf32>
    %c0_35 = arith.constant 0 : index
    %c56 = arith.constant 56 : index
    %67 = vector.load %arg5[%c0_35, %c56] : memref<16x96xf32, #tpu.memory_space<vmem>>, vector<16x8xf32>
    %68 = vector.shape_cast %67 : vector<16x8xf32> to vector<2x8x8xf32>
    %c0_36 = arith.constant 0 : index
    %c88 = arith.constant 88 : index
    %69 = vector.load %arg5[%c0_36, %c88] : memref<16x96xf32, #tpu.memory_space<vmem>>, vector<16x8xf32>
    %70 = vector.shape_cast %69 : vector<16x8xf32> to vector<2x8x8xf32>
    "tpu.trace_start"() <{level = 10 : i32, message = "bid,bjd->bij"}> : () -> ()
    %cst_37 = arith.constant dense<0.000000e+00> : vector<2x8x8xf32>
    %71 = tpu.matmul %66, %68, %cst_37 {dimension_numbers = #tpu.dot_dimension_numbers<[2], [2], [1], [1], [0, 0, 0, 1, 1, 1], [0], [0]>} : vector<2x8x8xf32>, vector<2x8x8xf32>, vector<2x8x8xf32> -> vector<2x8x8xf32>
    "tpu.trace_stop"() : () -> ()
    %cst_38 = arith.constant dense<0xFF800000> : vector<2x8xf32>
    %72 = vector.multi_reduction <maximumf>, %71, %cst_38 [2] : vector<2x8x8xf32> to vector<2x8xf32>
    %73 = vector.shape_cast %72 : vector<2x8xf32> to vector<2x8x1xf32>
    %74 = vector.broadcast %73 : vector<2x8x1xf32> to vector<2x8x8xf32>
    %75 = arith.subf %71, %74 : vector<2x8x8xf32>
    %76 = math.exp %75 : vector<2x8x8xf32>
    %cst_39 = arith.constant dense<0.000000e+00> : vector<2x8xf32>
    %77 = vector.multi_reduction <add>, %76, %cst_39 [2] : vector<2x8x8xf32> to vector<2x8xf32>
    %78 = vector.shape_cast %77 : vector<2x8xf32> to vector<2x8x1xf32>
    %79 = tpu.reciprocal %78 {approx = true} : vector<2x8x1xf32> -> vector<2x8x1xf32>
    %80 = vector.broadcast %79 : vector<2x8x1xf32> to vector<2x8x8xf32>
    %81 = arith.mulf %76, %80 : vector<2x8x8xf32>
    "tpu.trace_start"() <{level = 10 : i32, message = "bij,bjd->bid"}> : () -> ()
    %cst_40 = arith.constant dense<0.000000e+00> : vector<2x8x8xf32>
    %82 = tpu.matmul %81, %70, %cst_40 {dimension_numbers = #tpu.dot_dimension_numbers<[2], [1], [1], [2], [0, 0, 0, 1, 1, 2], [0], [0]>} : vector<2x8x8xf32>, vector<2x8x8xf32>, vector<2x8x8xf32> -> vector<2x8x8xf32>
    "tpu.trace_stop"() : () -> ()
    %83 = vector.shape_cast %82 : vector<2x8x8xf32> to vector<16x8xf32>
    %c0_41 = arith.constant 0 : index
    %c24_42 = arith.constant 24 : index
    %84 = vector.load %arg6[%c0_41, %c24_42] : memref<16x32xf32, #tpu.memory_space<vmem>>, vector<16x8xf32>
    tpu.vector_store %arg6[%c0_41, %c24_42], %83 {strides = array<i32>} : memref<16x32xf32, #tpu.memory_space<vmem>>, vector<16x8xf32>,
    %c0_43 = arith.constant 0 : index
    %c0_44 = arith.constant 0 : index
    %85 = vector.load %arg6[%c0_43, %c0_44] : memref<16x32xf32, #tpu.memory_space<vmem>>, vector<16x32xf32>
    %c0_45 = arith.constant 0 : index
    %c0_46 = arith.constant 0 : index
    %86 = vector.load %arg3[%c0_45, %c0_46] : memref<32x32xf32, #tpu.memory_space<vmem>>, vector<32x32xf32>
    %cst_47 = arith.constant dense<0.000000e+00> : vector<16x32xf32>
    %87 = tpu.matmul %85, %86, %cst_47 {dimension_numbers = #tpu.dot_dimension_numbers<[1], [0], [0], [1], [0, 0, 1, 1], [], []>} : vector<16x32xf32>, vector<32x32xf32>, vector<16x32xf32> -> vector<16x32xf32>
    %88 = vector.shape_cast %87 : vector<16x32xf32> to vector<2x8x32xf32>
    %c0_48 = arith.constant 0 : index
    %c0_49 = arith.constant 0 : index
    %c0_50 = arith.constant 0 : index
    %89 = vector.load %arg4[%c0_48, %c0_49, %c0_50] : memref<2x8x32xf32, #tpu.memory_space<vmem>>, vector<2x8x32xf32>
    tpu.vector_store %arg4[%c0_48, %c0_49, %c0_50], %88 {strides = array<i32>} : memref<2x8x32xf32, #tpu.memory_space<vmem>>, vector<2x8x32xf32>,
    return
  }
  func.func @transform_0(%arg0: i32) -> (i32, i32, i32) {
    %c0_i32 = arith.constant 0 : i32
    %c0_i32_0 = arith.constant 0 : i32
    %c0_i32_1 = arith.constant 0 : i32
    return %arg0, %c0_i32, %c0_i32_0 : i32, i32, i32
  }
  func.func @transform_1(%arg0: i32) -> (i32, i32) {
    %c0_i32 = arith.constant 0 : i32
    %c0_i32_0 = arith.constant 0 : i32
    %c0_i32_1 = arith.constant 0 : i32
    return %c0_i32, %c0_i32_0 : i32, i32
  }
  func.func @transform_2(%arg0: i32) -> (i32, i32) {
    %c0_i32 = arith.constant 0 : i32
    %c0_i32_0 = arith.constant 0 : i32
    %c0_i32_1 = arith.constant 0 : i32
    return %c0_i32, %c0_i32_0 : i32, i32
  }
  func.func @transform_3(%arg0: i32) -> (i32, i32, i32) {
    %c0_i32 = arith.constant 0 : i32
    %c0_i32_0 = arith.constant 0 : i32
    %c0_i32_1 = arith.constant 0 : i32
    return %arg0, %c0_i32, %c0_i32_0 : i32, i32, i32
  }
}

</mosaic_0001>

<bundles_post_ra>
// kernel: tpu_custom_call.1
= control target key start
LH: loop header
LB: loop body
LE: loop exit
PB: predicated region body
PF: predicated region fallthrough
CT: control target
= control target key end

     0   :  { %8 = vsyncpa [#allocation5], 0  ;;  %s2201_s0 = inlined_call_operand.hbm [shape: f32[2,8,32], index: 0, kind: input, shape index: {}]   ;;  %s2202_s1 = inlined_call_operand.hbm [shape: f32[32,96], index: 1, kind: input, shape index: {}]   ;;  %s2203_s2 = inlined_call_operand.hbm [shape: f32[32,32], index: 2, kind: input, shape index: {}]   ;;  %s2204_s3 = inlined_call_operand.hbm [shape: f32[2,8,32], index: 3, kind: output, shape index: {}]  }
   0x1   :  { %9 = vsyncpa [#allocation8], 0 }
   0x2   :  { %10 = vsyncpa [#allocation6], 0  ;;  %s1959_s12 = smov [#allocation7]   ;;  %s1960_s14 = smov [#allocation4]  }
   0x3   :  { %s28_s13 = sshll.u32 %s1959_s12, 4  ;;  %s16_s15 = sshll.u32 %s1960_s14, 4  ;;  %s29_s13 = int_to_ptr.vmem [resolvable:$true] %s28_s13  ;;  %s2000_s15 = int_to_ptr.vmem [resolvable:$true] %s16_s15 }
   0x4   :  { %s1865_s18 = scalar_lea.hbm %s2202_s1, 512 }
   0x5   :  { %p1866_p0 = scmp.ne.s32.totalorder %s2202_s1, %s1865_s18  ;;  %p1869_p1 = scmp.lt.u32.totalorder %s1865_s18, %s2202_s1 }
   0x7   :  { %p1871_p2 = pnand %p1869_p1, %p1866_p0 }
   0x9   :  { %1874 = shalt.err (!%p1871_p2)
}
   0xa   :  { %s1875_s23 = scalar_lea.vmem %s29_s13, 512  ;;  %p1880_p4 = scmp.lt.s32.totalorder %s29_s13, %s29_s13 }
   0xb   :  { %p1876_p3 = scmp.ne.s32.totalorder %s29_s13, %s1875_s23  ;;  %p1881_p5 = scmp.lt.s32.totalorder %s1875_s23, %s1875_s23 }
   0xd   :  { %p1882_p6 = por %p1881_p5, %p1880_p4 }
   0xf   :  { %p1883_p7 = pnand %p1882_p6, %p1876_p3 }
  0x11   :  { %1886 = shalt.err (!%p1883_p7)
}
  0x12   :  { %s1961_s24 = smov 128   ;;  %s1962_s25 = smov 8  }
  0x13   :  { %34 = dma.hbm_to_vmem [thread:$0]  %s2202_s1, 512, %s29_s13, [#allocation8], %s1961_s24, %s1961_s24, %s1962_s25  }
  0x14   :  { %s1887_s30 = scalar_lea.hbm %s2201_s0, 256 }
  0x15   :  { %p1888_p8 = scmp.ne.s32.totalorder %s2201_s0, %s1887_s30  ;;  %p1891_p9 = scmp.lt.u32.totalorder %s1887_s30, %s2201_s0 }
  0x17   :  { %p1893_p10 = pnand %p1891_p9, %p1888_p8 }
  0x19   :  { %1896 = shalt.err (!%p1893_p10)
}
  0x1a   :  { %s1897_s8 = scalar_lea.vmem %s2000_s15, 256  ;;  %p1902_p12 = scmp.lt.s32.totalorder %s2000_s15, %s2000_s15 }
  0x1b   :  { %p1898_p11 = scmp.ne.s32.totalorder %s2000_s15, %s1897_s8  ;;  %p1903_p13 = scmp.lt.s32.totalorder %s1897_s8, %s1897_s8 }
  0x1d   :  { %p1904_p0 = por %p1903_p13, %p1902_p12 }
  0x1f   :  { %p1905_p1 = pnand %p1904_p0, %p1898_p11 }
  0x21   :  { %1908 = shalt.err (!%p1905_p1)
}
  0x22   :  { %22 = dma.hbm_to_vmem [thread:$0]  %s2201_s0, 256, %s2000_s15, [#allocation5], %s1961_s24, %s1961_s24, %s1962_s25  }
  0x23   :  { %s1963_s10 = smov [#allocation9]   ;;  %s1909_s14 = scalar_lea.hbm %s2203_s2, 512 }
  0x24   :  { %s40_s11 = sshll.u32 %s1963_s10, 4  ;;  %p1910_p2 = scmp.ne.s32.totalorder %s2203_s2, %s1909_s14  ;;  %s41_s11 = int_to_ptr.vmem [resolvable:$true] %s40_s11 }
  0x25   :  { %p1913_p3 = scmp.lt.u32.totalorder %s1909_s14, %s2203_s2 }
  0x27   :  { %p1915_p4 = pnand %p1913_p3, %p1910_p2 }
  0x29   :  { %1918 = shalt.err (!%p1915_p4)
}
  0x2a   :  { %s1919_s20 = scalar_lea.vmem %s41_s11, 512  ;;  %p1924_p6 = scmp.lt.s32.totalorder %s41_s11, %s41_s11 }
  0x2b   :  { %p1920_p5 = scmp.ne.s32.totalorder %s41_s11, %s1919_s20  ;;  %p1925_p7 = scmp.lt.s32.totalorder %s1919_s20, %s1919_s20 }
  0x2d   :  { %p1926_p8 = por %p1925_p7, %p1924_p6 }
  0x2f   :  { %p1927_p9 = pnand %p1926_p8, %p1920_p5 }
  0x31   :  { %1930 = shalt.err (!%p1927_p9)
}
  0x32   :  { %46 = dma.hbm_to_vmem [thread:$0]  %s2203_s2, 512, %s41_s11, [#allocation8], %s1961_s24, %s1961_s24, %s1962_s25  }
  0x33   :  { %1953 = dma.done.wait [#allocation5], 256  }
  0x34   :  { %1954 = vsyncadd [#allocation5], 4294967040 }
  0x35   :  { %1955 = dma.done.wait [#allocation8], 1024  }
  0x36   :  { %1956 = vsyncadd [#allocation8], 4294966272  ;;  %vm62_vm0 = vcmask 261120   ;;  %v58_v0 = vld [vmem:[#allocation7] sm:$0xff]  ;;  %v59_v1 = vld [vmem:[#allocation7 + $0x8] sm:$0xff]  ;;  %v1964_v8 = vmov 0.0  }
  0x37   :  { %v60_v2 = vld [vmem:[#allocation7 + $0x10] sm:$0xff]  ;;  %v1796_v3 = vpack.c.bf16 %v59_v1, %v58_v0  ;;  %v61_v4 = vld [vmem:[#allocation7 + $0x18] sm:$0xff]  ;;  %1705 = vmatprep.subr.mxu1 %v1964_v8  ;;  %vm144_vm1 = vcmask 785408   ;;  %vm1965_vm2 = vmmov 0   ;;  %s1966_s2 = smov 96   ;;  %vm152_vm3 = vcmask 64512  }
  0x38   :  { %v56_v5 = vld [vmem:[#allocation4] sm:$0xff]  ;;  %v1800_v6 = vpack.c.bf16 %v61_v4, %v60_v2  ;;  %v57_v7 = vld [vmem:[#allocation4 + $0x8] sm:$0xff]  ;;  %1707 = vmatprep.mubr.msk.f32.mxu1 %vm1965_vm2, %v1964_v8  ;;  %s1967_s21 = smov 64   ;;  %s1968_s22 = smov 88   ;;  %vm822_vm4 = vcmask 130112   ;;  %vm1167_vm5 = vcmask 195712  }
  0x39   :  { %1702 = vmatprep.mubr.msk.f32.mxu0 %vm62_vm0, %v56_v5  ;;  %1797 = vmatprep.subr.bf16.mxu0 %v1796_v3  ;;  %s1969_s23 = smov 120   ;;  %s1970_s26 = smov 56   ;;  %vm1512_vm6 = vcmask 261312  }
  0x3a   :  { %1799 = vmatpush3.bf16.msra.mxu0 %v1796_v3  ;;  %s1971_s27 = smov 112   ;;  %s1972_s28 = smov 80  }
  0x3b   :  { %1801 = vmatprep.subr.bf16.mxu0 %v1800_v6  ;;  %s1973_s29 = smov 48   ;;  %s1974_s30 = smov 72  }
  0x3c   :  { %s1975_s4 = smov 104   ;;  %s1976_s5 = smov 40  }
  0x3d   :  { %s1977_s6 = smov 16   ;;  %s1978_s7 = smov 24  }
  0x3e   :  { %1803 = vmatpush3.bf16.msra.mxu0 %v1800_v6  ;;  %s1979_s8 = smov [#allocation10]  }
  0x3f   :  { %1725 = vmatprep.subr.mxu0 %v1964_v8  ;;  %s1609_s1 = sshll.u32 %s1979_s8, 4  ;;  %s1610_s1 = int_to_ptr.vmem [resolvable:$true] %s1609_s1 }
  0x40   :  { %s1931_s9 = scalar_lea.vmem %s1610_s1, 256  ;;  %p1936_p11 = scmp.lt.s32.totalorder %s1610_s1, %s1610_s1 }
  0x41   :  { %1703 = vmatmul.mubr.msk.f32.vlgmr.msra.gmra.mrb[0].mxu0 %vm62_vm0, %v57_v7  ;;  %p1932_p10 = scmp.ne.s32.totalorder %s1610_s1, %s1931_s9  ;;  %p1937_p12 = scmp.lt.s32.totalorder %s1931_s9, %s1931_s9 }
  0x42   :  { %1727 = vmatprep.mubr.msk.f32.mxu0 %vm1965_vm2, %v1964_v8 }
  0x43   :  { %p1938_p13 = por %p1937_p12, %p1936_p11 }
  0x45   :  { %p1939_p0 = pnand %p1938_p13, %p1932_p10 }
 0x114   :  { %v1704_v9 = vpop.f32.mrb[0].mxu0 }
 0x115   :  { %146 = vst.msk [vmem:[#allocation2 + $0x8] sm:$0xff] %vm144_vm1, %v1704_v9  ;;  %v135_v10 = vpop.f32.mrb[1].mxu0 }
 0x116   :  { %145 = vst.msk [vmem:[#allocation2] sm:$0xff] %vm144_vm1, %v135_v10 }
 0x11c   :  { %v2063_v12 = vld [vmem:[#allocation2 + $0x8] sm:$0xff] }
 0x11d   :  { %v2060_v11 = vld [vmem:[#allocation2] sm:$0xff] }
 0x11e   :  { %150 = vrot.lane.b32.xlu0 %v2060_v11, %s1966_s2 }
 0x122   :  { %228 = vrot.lane.b32.xlu0 %v2063_v12, %s1966_s2 }
 0x190   :  { %v151_v13 = vpop.permute.xlu0 %150 }
 0x191   :  { %1706 = vmatpush3.xpose.msk.msra.mxu1 %vm152_vm3, %v151_v13 }
 0x192   :  { %1710 = vmatprep.subr.mxu1 %v1964_v8 }
 0x194   :  { %1708 = vmatmul.mubr.msk.f32.vlgmr.msra.gmra.mrb[0].mxu1 %vm152_vm3, %v2060_v11  ;;  %v229_v14 = vpop.permute.xlu0 %228 }
 0x195   :  { %1711 = vmatpush3.xpose.msk.msra.mxu1 %vm152_vm3, %v229_v14  ;;  %1712 = vmatprep.mubr.msk.f32.mxu1 %vm1965_vm2, %v1964_v8 }
 0x196   :  { %1715 = vmatprep.subr.mxu1 %v1964_v8 }
 0x198   :  { %1713 = vmatmul.mubr.msk.f32.vlgmr.msra.gmra.mrb[2].mxu1 %vm152_vm3, %v2063_v12 }
 0x199   :  { %1717 = vmatprep.mubr.msk.f32.mxu1 %vm1965_vm2, %v1964_v8 }
 0x267   :  { %v223_v15 = vpop.f32.mrb[0].mxu1 }
 0x268   :  { %v1709_v16 = vpop.f32.mrb[1].mxu1  ;;  %v304_v17 = vsel %vm152_vm3, %v223_v15, -inf }
 0x269   :  { %305 = vmax.xlane.f32.xlu1 %v304_v17 }
 0x26b   :  { %v300_v18 = vpop.f32.mrb[2].mxu1 }
 0x26c   :  { %v1714_v19 = vpop.f32.mrb[3].mxu1  ;;  %v307_v20 = vsel %vm152_vm3, %v300_v18, -inf }
 0x26d   :  { %308 = vmax.xlane.f32.xlu1 %v307_v20 }
 0x27e   :  { %326 = vrot.lane.b32.xlu1 %v2060_v11, %s1967_s21 }
 0x282   :  { %402 = vrot.lane.b32.xlu1 %v2063_v12, %s1967_s21 }
 0x286   :  { %485 = vrot.lane.b32.xlu1 %v2060_v11, %s1968_s22 }
 0x28a   :  { %564 = vrot.lane.b32.xlu1 %v2063_v12, %s1968_s22 }
 0x2f6   :  { %v306_v21 = vpop.xlane.xlu1 %305 }
 0x2f7   :  { %v310_v22 = vsub.f32 %v223_v15, %v306_v21 }
 0x2f9   :  { %v312_v23 = vmul.f32 1.442695, %v310_v22 }
 0x2fa   :  { %v309_v24 = vpop.xlane.xlu1 %308 }
 0x2fb   :  { %1833 = vpow2.f32 %v312_v23  ;;  %v311_v25 = vsub.f32 %v300_v18, %v309_v24 }
 0x2fd   :  { %v314_v26 = vmul.f32 1.442695, %v311_v25 }
 0x2fe   :  { %v327_v27 = vpop.permute.xlu1 %326 }
 0x2ff   :  { %1835 = vpow2.f32 %v314_v26  ;;  %1716 = vmatpush3.msra.mxu1 %v327_v27 }
 0x300   :  { %1720 = vmatprep.subr.mxu1 %v1964_v8 }
 0x302   :  { %v403_v28 = vpop.permute.xlu1 %402 }
 0x305   :  { %v1834_v29 = vpop.eup %1833 }
 0x306   :  { %v486_v30 = vpop.permute.xlu1 %485  ;;  %v316_v31 = vsel %vm152_vm3, %v1834_v29, 0.0 }
 0x307   :  { %317 = vadd.xlane.f32.xlu0 %v316_v31  ;;  %1726 = vmatpush3.xpose.msk.msra.mxu0 %vm152_vm3, %v486_v30 }
 0x308   :  { %1735 = vmatprep.subr.mxu0 %v1964_v8 }
 0x309   :  { %v1836_v32 = vpop.eup %1835 }
 0x30a   :  { %v319_v33 = vsel %vm152_vm3, %v1836_v32, 0.0  ;;  %v565_v34 = vpop.permute.xlu1 %564 }
 0x30b   :  { %320 = vadd.xlane.f32.xlu1 %v319_v33 }
 0x31c   :  { %562 = vrot.lane.b32.xlu1 %v2063_v12, %s1969_s23 }
 0x31d   :  { %483 = vrot.lane.b32.xlu0 %v2060_v11, %s1969_s23 }
 0x394   :  { %v318_v35 = vpop.xlane.xlu0 %317 }
 0x395   :  { %1837 = vrcp.f32 %v318_v35 }
 0x398   :  { %v321_v36 = vpop.xlane.xlu1 %320  ;;  %v484_v37 = vpop.permute.xlu0 %483 }
 0x399   :  { %1839 = vrcp.f32 %v321_v36  ;;  %1728 = vmatmul.mubr.msk.f32.vlgmr.msra.gmra.mrb[2].mxu0 %vm152_vm3, %v484_v37 }
 0x39a   :  { %1737 = vmatprep.mubr.msk.f32.mxu0 %vm1965_vm2, %v1964_v8 }
 0x39c   :  { %v563_v42 = vpop.permute.xlu1 %562 }
 0x39f   :  { %v1838_v38 = vpop.eup %1837 }
 0x3a0   :  { %v324_v39 = vmul.f32 %v1838_v38, %v1834_v29 }
 0x3a2   :  { %1718 = vmatmul.mubr.msk.f32.vlgmr.msra.gmra.mrb[4].mxu1 %vm152_vm3, %v324_v39 }
 0x3a3   :  { %v1840_v40 = vpop.eup %1839  ;;  %1721 = vmatpush3.msra.mxu1 %v403_v28  ;;  %1722 = vmatprep.mubr.msk.f32.mxu1 %vm1965_vm2, %v1964_v8 }
 0x3a4   :  { %v325_v41 = vmul.f32 %v1840_v40, %v1836_v32  ;;  %1730 = vmatprep.subr.mxu1 %v1964_v8 }
 0x3a6   :  { %1723 = vmatmul.mubr.msk.f32.vlgmr.msra.gmra.mrb[6].mxu1 %vm152_vm3, %v325_v41 }
 0x3a7   :  { %1732 = vmatprep.mubr.msk.f32.mxu1 %vm1965_vm2, %v1964_v8 }
 0x3aa   :  { %1731 = vmatpush3.xpose.msk.msra.mxu1 %vm152_vm3, %v565_v34 }
 0x3ab   :  { %1740 = vmatprep.subr.mxu1 %v1964_v8 }
 0x3ad   :  { %1733 = vmatmul.mubr.msk.f32.vlgmr.msra.gmra.mrb[8].mxu1 %vm152_vm3, %v563_v42 }
 0x3ae   :  { %1742 = vmatprep.mubr.msk.f32.mxu1 %vm1965_vm2, %v1964_v8 }
 0x46c   :  { %v557_v43 = vpop.f32.mrb[2].mxu0 }
 0x46d   :  { %v1729_v44 = vpop.f32.mrb[3].mxu0  ;;  %v640_v45 = vsel %vm152_vm3, %v557_v43, -inf }
 0x46e   :  { %641 = vmax.xlane.f32.xlu1 %v640_v45 }
 0x475   :  { %v398_v46 = vpop.f32.mrb[4].mxu1 }
 0x476   :  { %478 = vst.msk [vmem:[#allocation3] sm:$0xff] %vm152_vm3, %v398_v46  ;;  %v1719_v47 = vpop.f32.mrb[5].mxu1 }
 0x479   :  { %v474_v48 = vpop.f32.mrb[6].mxu1 }
 0x47a   :  { %479 = vst.msk [vmem:[#allocation3 + $0x8] sm:$0xff] %vm152_vm3, %v474_v48  ;;  %v1724_v49 = vpop.f32.mrb[7].mxu1 }
 0x480   :  { %v636_v50 = vpop.f32.mrb[8].mxu1 }
 0x481   :  { %v1734_v51 = vpop.f32.mrb[9].mxu1  ;;  %v643_v52 = vsel %vm152_vm3, %v636_v50, -inf }
 0x482   :  { %644 = vmax.xlane.f32.xlu0 %v643_v52 }
 0x498   :  { %738 = vrot.lane.b32.xlu0 %v2063_v12, %s1970_s26 }
 0x49c   :  { %828 = vrot.lane.b32.xlu0 %v2060_v11, %s1971_s27 }
 0x4fb   :  { %v642_v53 = vpop.xlane.xlu1 %641 }
 0x4fc   :  { %v646_v54 = vsub.f32 %v557_v43, %v642_v53 }
 0x4fe   :  { %v648_v55 = vmul.f32 1.442695, %v646_v54 }
 0x500   :  { %1841 = vpow2.f32 %v648_v55 }
 0x50a   :  { %v1842_v56 = vpop.eup %1841 }
 0x50b   :  { %v652_v57 = vsel %vm152_vm3, %v1842_v56, 0.0 }
 0x50c   :  { %653 = vadd.xlane.f32.xlu1 %v652_v57 }
 0x50f   :  { %v645_v58 = vpop.xlane.xlu0 %644 }
 0x510   :  { %v647_v60 = vsub.f32 %v636_v50, %v645_v58 }
 0x512   :  { %v650_v61 = vmul.f32 1.442695, %v647_v60 }
 0x513   :  { %v739_v59 = vpop.permute.xlu0 %738 }
 0x514   :  { %1741 = vmatpush3.msra.mxu1 %v739_v59  ;;  %1843 = vpow2.f32 %v650_v61 }
 0x515   :  { %1750 = vmatprep.subr.mxu1 %v1964_v8 }
 0x517   :  { %v829_v5 = vpop.permute.xlu0 %828 }
 0x51d   :  { %662 = vrot.lane.b32.xlu1 %v2060_v11, %s1970_s26 }
 0x51e   :  { %v1844_v62 = vpop.eup %1843 }
 0x51f   :  { %v655_v63 = vsel %vm152_vm3, %v1844_v62, 0.0 }
 0x521   :  { %830 = vrot.lane.b32.xlu1 %v2060_v11, %s1972_s28 }
 0x525   :  { %909 = vrot.lane.b32.xlu1 %v2063_v12, %s1972_s28 }
 0x549   :  { %656 = vadd.xlane.f32.xlu1 %v655_v63 }
 0x55a   :  { %907 = vrot.lane.b32.xlu1 %v2063_v12, %s1971_s27 }
 0x599   :  { %v654_v0 = vpop.xlane.xlu1 %653 }
 0x59a   :  { %1845 = vrcp.f32 %v654_v0 }
 0x59d   :  { %v663_v1 = vpop.permute.xlu1 %662 }
 0x59e   :  { %1736 = vmatpush3.msra.mxu0 %v663_v1 }
 0x59f   :  { %1745 = vmatprep.subr.mxu0 %v1964_v8 }
 0x5a1   :  { %v831_v4 = vpop.permute.xlu1 %830 }
 0x5a4   :  { %v1846_v2 = vpop.eup %1845 }
 0x5a5   :  { %v660_v3 = vmul.f32 %v1846_v2, %v1842_v56  ;;  %v910_v6 = vpop.permute.xlu1 %909 }
 0x5a7   :  { %1738 = vmatmul.mubr.msk.f32.vlgmr.msra.gmra.mrb[4].mxu0 %vm152_vm3, %v660_v3 }
 0x5a8   :  { %1746 = vmatpush3.xpose.msk.msra.mxu0 %vm152_vm3, %v831_v4  ;;  %1747 = vmatprep.mubr.msk.f32.mxu0 %vm1965_vm2, %v1964_v8 }
 0x5a9   :  { %1755 = vmatprep.subr.mxu0 %v1964_v8 }
 0x5ab   :  { %1748 = vmatmul.mubr.msk.f32.vlgmr.msra.gmra.mrb[6].mxu0 %vm152_vm3, %v829_v5 }
 0x5ac   :  { %1757 = vmatprep.mubr.msk.f32.mxu0 %vm1965_vm2, %v1964_v8 }
 0x5d6   :  { %v657_v7 = vpop.xlane.xlu1 %656 }
 0x5d7   :  { %1847 = vrcp.f32 %v657_v7 }
 0x5da   :  { %v908_v13 = vpop.permute.xlu1 %907 }
 0x5e1   :  { %v1848_v9 = vpop.eup %1847 }
 0x5e2   :  { %v661_v10 = vmul.f32 %v1848_v9, %v1844_v62 }
 0x5e4   :  { %1743 = vmatmul.mubr.msk.f32.vlgmr.msra.gmra.mrb[10].mxu1 %vm152_vm3, %v661_v10 }
 0x5e5   :  { %1751 = vmatpush3.xpose.msk.msra.mxu1 %vm152_vm3, %v910_v6  ;;  %1752 = vmatprep.mubr.msk.f32.mxu1 %vm1965_vm2, %v1964_v8 }
 0x5e6   :  { %1760 = vmatprep.subr.mxu1 %v1964_v8 }
 0x5e8   :  { %1753 = vmatmul.mubr.msk.f32.vlgmr.msra.gmra.mrb[12].mxu1 %vm152_vm3, %v908_v13 }
 0x5e9   :  { %1762 = vmatprep.mubr.msk.f32.mxu1 %vm1965_vm2, %v1964_v8 }
 0x67a   :  { %v2136_v14 = vpop.f32.mrb[4].mxu0 }
 0x67b   :  { %v1739_v15 = vpop.f32.mrb[5].mxu0 }
 0x67c   :  { %v1517_v15 = vld [vmem:[#allocation9] sm:$0xff] }
 0x67e   :  { %v902_v16 = vpop.f32.mrb[6].mxu0 }
 0x67f   :  { %v1749_v17 = vpop.f32.mrb[7].mxu0  ;;  %v985_v18 = vsel %vm152_vm3, %v902_v16, -inf }
 0x680   :  { %986 = vmax.xlane.f32.xlu0 %v985_v18 }
 0x6b7   :  { %v2139_v19 = vpop.f32.mrb[10].mxu1 }
 0x6b8   :  { %v1744_v20 = vpop.f32.mrb[11].mxu1 }
 0x6b9   :  { %v1520_v20 = vld [vmem:[#allocation9 + $0x18] sm:$0xff] }
 0x6bb   :  { %v981_v21 = vpop.f32.mrb[12].mxu1 }
 0x6bc   :  { %v1754_v22 = vpop.f32.mrb[13].mxu1  ;;  %v988_v23 = vsel %vm152_vm3, %v981_v21, -inf }
 0x6bd   :  { %989 = vmax.xlane.f32.xlu1 %v988_v23 }
 0x6ce   :  { %1007 = vrot.lane.b32.xlu1 %v2060_v11, %s1973_s29 }
 0x6d2   :  { %1175 = vrot.lane.b32.xlu1 %v2060_v11, %s1974_s30 }
 0x6d6   :  { %1254 = vrot.lane.b32.xlu1 %v2063_v12, %s1974_s30 }
 0x6da   :  { %1252 = vrot.lane.b32.xlu1 %v2063_v12, %s1975_s4 }
 0x70d   :  { %v987_v24 = vpop.xlane.xlu0 %986 }
 0x70e   :  { %v991_v25 = vsub.f32 %v902_v16, %v987_v24 }
 0x710   :  { %v993_v26 = vmul.f32 1.442695, %v991_v25 }
 0x712   :  { %1849 = vpow2.f32 %v993_v26 }
 0x71c   :  { %v1850_v27 = vpop.eup %1849 }
 0x71d   :  { %v997_v28 = vsel %vm152_vm3, %v1850_v27, 0.0 }
 0x71e   :  { %998 = vadd.xlane.f32.xlu0 %v997_v28 }
 0x734   :  { %1083 = vrot.lane.b32.xlu0 %v2063_v12, %s1973_s29 }
 0x74a   :  { %v990_v29 = vpop.xlane.xlu1 %989 }
 0x74b   :  { %v992_v30 = vsub.f32 %v981_v21, %v990_v29 }
 0x74d   :  { %v995_v31 = vmul.f32 1.442695, %v992_v30 }
 0x74e   :  { %v1008_v32 = vpop.permute.xlu1 %1007 }
 0x74f   :  { %1851 = vpow2.f32 %v995_v31  ;;  %1756 = vmatpush3.msra.mxu0 %v1008_v32 }
 0x750   :  { %1765 = vmatprep.subr.mxu0 %v1964_v8 }
 0x752   :  { %v1176_v39 = vpop.permute.xlu1 %1175 }
 0x756   :  { %v1255_v43 = vpop.permute.xlu1 %1254 }
 0x759   :  { %v1852_v33 = vpop.eup %1851 }
 0x75a   :  { %v1000_v34 = vsel %vm152_vm3, %v1852_v33, 0.0  ;;  %v1253_v45 = vpop.permute.xlu1 %1252 }
 0x75b   :  { %1001 = vadd.xlane.f32.xlu0 %v1000_v34 }
 0x771   :  { %1173 = vrot.lane.b32.xlu0 %v2060_v11, %s1975_s4 }
 0x7ab   :  { %v999_v35 = vpop.xlane.xlu0 %998 }
 0x7ac   :  { %1853 = vrcp.f32 %v999_v35 }
 0x7af   :  { %v1084_v36 = vpop.permute.xlu0 %1083 }
 0x7b0   :  { %1761 = vmatpush3.msra.mxu1 %v1084_v36 }
 0x7b1   :  { %1770 = vmatprep.subr.mxu1 %v1964_v8 }
 0x7b6   :  { %v1854_v37 = vpop.eup %1853 }
 0x7b7   :  { %v1005_v38 = vmul.f32 %v1854_v37, %v1850_v27 }
 0x7b9   :  { %1758 = vmatmul.mubr.msk.f32.vlgmr.msra.gmra.mrb[8].mxu0 %vm152_vm3, %v1005_v38 }
 0x7ba   :  { %1766 = vmatpush3.xpose.msk.msra.mxu0 %vm152_vm3, %v1176_v39  ;;  %1767 = vmatprep.mubr.msk.f32.mxu0 %vm1965_vm2, %v1964_v8 }
 0x7bb   :  { %1775 = vmatprep.subr.mxu0 %v1964_v8 }
 0x7e8   :  { %v1002_v40 = vpop.xlane.xlu0 %1001 }
 0x7e9   :  { %1855 = vrcp.f32 %v1002_v40 }
 0x7ec   :  { %v1174_v41 = vpop.permute.xlu0 %1173 }
 0x7ed   :  { %1768 = vmatmul.mubr.msk.f32.vlgmr.msra.gmra.mrb[10].mxu0 %vm152_vm3, %v1174_v41 }
 0x7ee   :  { %1777 = vmatprep.mubr.msk.f32.mxu0 %vm1965_vm2, %v1964_v8 }
 0x7f3   :  { %v1856_v42 = vpop.eup %1855 }
 0x7f4   :  { %v1006_v44 = vmul.f32 %v1856_v42, %v1852_v33 }
 0x7f6   :  { %1763 = vmatmul.mubr.msk.f32.vlgmr.msra.gmra.mrb[14].mxu1 %vm152_vm3, %v1006_v44 }
 0x7f7   :  { %1771 = vmatpush3.xpose.msk.msra.mxu1 %vm152_vm3, %v1255_v43  ;;  %1772 = vmatprep.mubr.msk.f32.mxu1 %vm1965_vm2, %v1964_v8 }
 0x7f8   :  { %1780 = vmatprep.subr.mxu1 %v1964_v8 }
 0x7fa   :  { %1773 = vmatmul.mubr.msk.f32.vlgmr.msra.gmra.mrb[16].mxu1 %vm152_vm3, %v1253_v45 }
 0x7fb   :  { %1782 = vmatprep.mubr.msk.f32.mxu1 %vm1965_vm2, %v1964_v8 }
 0x88c   :  { %v1079_v46 = vpop.f32.mrb[8].mxu0 }
 0x88d   :  { %v1759_v47 = vpop.f32.mrb[9].mxu0 }
 0x8c0   :  { %v1247_v48 = vpop.f32.mrb[10].mxu0 }
 0x8c1   :  { %v1769_v49 = vpop.f32.mrb[11].mxu0  ;;  %v1330_v50 = vsel %vm152_vm3, %v1247_v48, -inf }
 0x8c2   :  { %1331 = vmax.xlane.f32.xlu0 %v1330_v50 }
 0x8c9   :  { %v1155_v51 = vpop.f32.mrb[14].mxu1 }
 0x8ca   :  { %v1764_v52 = vpop.f32.mrb[15].mxu1 }
 0x8cd   :  { %v1326_v53 = vpop.f32.mrb[16].mxu1 }
 0x8ce   :  { %v1774_v54 = vpop.f32.mrb[17].mxu1  ;;  %v1333_v55 = vsel %vm152_vm3, %v1326_v53, -inf }
 0x8cf   :  { %1334 = vmax.xlane.f32.xlu1 %v1333_v55 }
 0x8e0   :  { %1352 = vrot.lane.b32.xlu1 %v2060_v11, %s1976_s5 }
 0x8e4   :  { %816 = vrot.lane.b32.xlu1 %v2136_v14, %s1962_s25 }
 0x8e8   :  { %818 = vrot.lane.b32.xlu1 %v2139_v19, %s1962_s25  ;;  %v1519_v19 = vld [vmem:[#allocation9 + $0x10] sm:$0xff] }
 0x8e9   :  { %v1808_v21 = vpack.c.bf16 %v1520_v20, %v1519_v19 }
 0x8ec   :  { %1163 = vrot.lane.b32.xlu1 %v1155_v51, %s1977_s6 }
 0x94f   :  { %v1332_v8 = vpop.xlane.xlu0 %1331 }
 0x950   :  { %v1336_v56 = vsub.f32 %v1247_v48, %v1332_v8 }
 0x952   :  { %v1338_v57 = vmul.f32 1.442695, %v1336_v56 }
 0x954   :  { %1857 = vpow2.f32 %v1338_v57 }
 0x95c   :  { %v1335_v58 = vpop.xlane.xlu1 %1334 }
 0x95d   :  { %v1337_v59 = vsub.f32 %v1326_v53, %v1335_v58 }
 0x95e   :  { %v1858_v60 = vpop.eup %1857 }
 0x95f   :  { %v1340_v61 = vmul.f32 1.442695, %v1337_v59  ;;  %v1342_v62 = vsel %vm152_vm3, %v1858_v60, 0.0 }
 0x960   :  { %v1353_v63 = vpop.permute.xlu1 %1352  ;;  %1343 = vadd.xlane.f32.xlu0 %v1342_v62 }
 0x961   :  { %1859 = vpow2.f32 %v1340_v61  ;;  %1776 = vmatpush3.msra.mxu0 %v1353_v63 }
 0x964   :  { %v817_v11 = vpop.permute.xlu1 %816 }
 0x965   :  { %823 = vst.msk [vmem:[#allocation3] sm:$0xff] %vm822_vm4, %v817_v11 }
 0x968   :  { %v819_v0 = vpop.permute.xlu1 %818 }
 0x969   :  { %824 = vst.msk [vmem:[#allocation3 + $0x8] sm:$0xff] %vm822_vm4, %v819_v0 }
 0x96b   :  { %v1860_v1 = vpop.eup %1859 }
 0x96c   :  { %v1164_v2 = vpop.permute.xlu1 %1163  ;;  %v1345_v3 = vsel %vm152_vm3, %v1860_v1, 0.0 }
 0x96d   :  { %1169 = vst.msk [vmem:[#allocation3 + $0x8] sm:$0xff] %vm1167_vm5, %v1164_v2  ;;  %1346 = vadd.xlane.f32.xlu0 %v1345_v3 }
 0x983   :  { %1428 = vrot.lane.b32.xlu0 %v2063_v12, %s1976_s5  ;;  %v1518_v12 = vld [vmem:[#allocation9 + $0x8] sm:$0xff] }
 0x984   :  { %v1804_v17 = vpack.c.bf16 %v1518_v12, %v1517_v15 }
 0x986   :  { %1805 = vmatprep.subr.bf16.mxu0 %v1804_v17 }
 0x987   :  { %1161 = vrot.lane.b32.xlu0 %v1079_v46, %s1977_s6 }
 0x9ed   :  { %v1344_v4 = vpop.xlane.xlu0 %1343 }
 0x9ee   :  { %1861 = vrcp.f32 %v1344_v4 }
 0x9f8   :  { %v1862_v5 = vpop.eup %1861 }
 0x9f9   :  { %v1350_v6 = vmul.f32 %v1862_v5, %v1858_v60 }
 0x9fa   :  { %v1347_v7 = vpop.xlane.xlu0 %1346 }
 0x9fb   :  { %1863 = vrcp.f32 %v1347_v7  ;;  %1778 = vmatmul.mubr.msk.f32.vlgmr.msra.gmra.mrb[12].mxu0 %vm152_vm3, %v1350_v6 }
 0x9fc   :  { %1807 = vmatpush3.bf16.msra.mxu0 %v1804_v17 }
 0x9fd   :  { %1809 = vmatprep.subr.bf16.mxu0 %v1808_v21 }
 0x9fe   :  { %v1429_v9 = vpop.permute.xlu0 %1428 }
 0x9ff   :  { %1781 = vmatpush3.msra.mxu1 %v1429_v9 }
 0xa00   :  { %1811 = vmatpush3.bf16.msra.mxu0 %v1808_v21 }
 0xa02   :  { %v1162_v10 = vpop.permute.xlu0 %1161 }
 0xa03   :  { %1168 = vst.msk [vmem:[#allocation3] sm:$0xff] %vm1167_vm5, %v1162_v10 }
 0xa05   :  { %v1864_v13 = vpop.eup %1863 }
 0xa06   :  { %v1351_v14 = vmul.f32 %v1864_v13, %v1860_v1 }
 0xa08   :  { %1783 = vmatmul.mubr.msk.f32.vlgmr.msra.gmra.mrb[18].mxu1 %vm152_vm3, %v1351_v14 }
 0xace   :  { %v1424_v16 = vpop.f32.mrb[12].mxu0 }
 0xacf   :  { %1506 = vrot.lane.b32.xlu0 %v1424_v16, %s1978_s7  ;;  %v1779_v18 = vpop.f32.mrb[13].mxu0 }
 0xadb   :  { %v1500_v22 = vpop.f32.mrb[18].mxu1 }
 0xadc   :  { %1508 = vrot.lane.b32.xlu1 %v1500_v22, %s1978_s7  ;;  %v1784_v23 = vpop.f32.mrb[19].mxu1 }
 0xb41   :  { %v1507_v24 = vpop.permute.xlu0 %1506 }
 0xb42   :  { %1513 = vst.msk [vmem:[#allocation3] sm:$0xff] %vm1512_vm6, %v1507_v24 }
 0xb49   :  { %v1515_v25 = vld [vmem:[#allocation3] sm:$0xff] }
 0xb4a   :  { %1793 = vmatprep.mubr.msk.f32.mxu0 %vm62_vm0, %v1515_v25 }
 0xb4e   :  { %v1509_v26 = vpop.permute.xlu1 %1508 }
 0xb4f   :  { %1514 = vst.msk [vmem:[#allocation3 + $0x8] sm:$0xff] %vm1512_vm6, %v1509_v26 }
 0xb56   :  { %v1516_v27 = vld [vmem:[#allocation3 + $0x8] sm:$0xff] }
 0xb57   :  { %1794 = vmatmul.mubr.msk.f32.vlgmr.msra.gmra.mrb[14].mxu0 %vm62_vm0, %v1516_v27 }
 0xc2a   :  { %v1795_v28 = vpop.f32.mrb[14].mxu0 }
 0xc2b   :  { %1603 = vst.msk [vmem:[#allocation10 + $0x8] sm:$0xff] %vm62_vm0, %v1795_v28  ;;  %v1593_v29 = vpop.f32.mrb[15].mxu0 }
 0xc2c   :  { %1602 = vst.msk [vmem:[#allocation10] sm:$0xff] %vm62_vm0, %v1593_v29 }
 0xc2d   :  { %1942 = shalt.err (!%p1939_p0)
}
 0xc2e   :  { %s1943_s12 = scalar_lea.hbm %s2204_s3, 256 }
 0xc2f   :  { %p1944_p1 = scmp.ne.s32.totalorder %s2204_s3, %s1943_s12  ;;  %p1947_p2 = scmp.lt.u32.totalorder %s1943_s12, %s2204_s3 }
 0xc31   :  { %p1949_p3 = pnand %p1947_p2, %p1944_p1 }
 0xc33   :  { %1952 = shalt.err (!%p1949_p3)
}
 0xc34   :  { %1615 = dma.vmem_to_hbm [thread:$0]  %s1610_s1, 256, %s2204_s3, [#allocation6], %s1961_s24, %s1961_s24, %s1962_s25  }
 0xc35   :  { %1957 = dma.done.wait [#allocation6], 256  }
 0xc36   :  { %1958 = vsyncadd [#allocation6], 4294967040 }
 0xc37   :  { %1619 = vsyncpa [#allocation5], 1 }
 0xc38   :  { %1620 = vsyncpa [#allocation8], 1 }
 0xc39   :  { %1621 = vsyncpa [#allocation6], 1 }

</bundles_post_ra>
